<compile_context>
chip_gen: v6e
topology: v6e:2x2x1
jax: 0.10.0
libtpu: 0.0.40
codegen_flags: <defaults>
</compile_context>

<pallas_src>
import functools

import jax
import jax.numpy as jnp
from jax import lax
from jax.experimental import pallas as pl
from jax.experimental.pallas import tpu as pltpu

_LN_EPS = 1e-5
_INV_SQRT2 = 0.7071067811865476


# ----------------------------- in-kernel math -------------------------------

def _gelu_exact(x):
    # PyTorch nn.GELU(approximate='none'): 0.5 * x * (1 + erf(x / sqrt(2)))
    return 0.5 * x * (1.0 + lax.erf(x * _INV_SQRT2))


def _dual_bias_ln_gelu(h, vec, half):
    """bias-add + per-head LayerNorm + exact GELU on a lane-fused activation.

    h:   (tile_b, 2*half) f32, head 1 in lanes [0, half), head 2 in [half, 2*half)
    vec: (3, 2*half) f32 slab: row 0 = bias, row 1 = gamma, row 2 = beta
    """
    b = vec[0:1, :]
    g = vec[1:2, :]
    be = vec[2:3, :]
    h = h + b

    lane = lax.broadcasted_iota(jnp.int32, h.shape, 1)
    left = lane < half
    inv = 1.0 / float(half)

    # Per-head mean via masked lane reductions (sum_right = total - sum_left).
    s_all = jnp.sum(h, axis=-1, keepdims=True)
    s_l = jnp.sum(jnp.where(left, h, 0.0), axis=-1, keepdims=True)
    mean = jnp.where(left, s_l, s_all - s_l) * inv

    c = h - mean
    c2 = c * c
    v_all = jnp.sum(c2, axis=-1, keepdims=True)
    v_l = jnp.sum(jnp.where(left, c2, 0.0), axis=-1, keepdims=True)
    var = jnp.where(left, v_l, v_all - v_l) * inv

    y = c * lax.rsqrt(var + _LN_EPS) * g + be
    return _gelu_exact(y)


def _twin_q_kernel(x_ref, w1_ref, v1_ref, w2_ref, v2_ref, w3_ref, v3_ref,
                   w4_ref, b4_ref, out_ref, *, h1, h2, h3, mm_dtype):
    def mm(a, w_ref):
        return jnp.dot(a.astype(mm_dtype), w_ref[...],
                       preferred_element_type=jnp.float32)

    x = x_ref[...]
    h = _dual_bias_ln_gelu(mm(x, w1_ref), v1_ref[...], h1)
    h = _dual_bias_ln_gelu(mm(h, w2_ref), v2_ref[...], h2)
    h = _dual_bias_ln_gelu(mm(h, w3_ref), v3_ref[...], h3)
    q = mm(h, w4_ref) + b4_ref[...]          # (tile_b, 2): col 0 = q1, col 1 = q2
    out_ref[...] = q.astype(out_ref.dtype)


# ------------------------------ param packing --------------------------------

def _block_diag(a, b):
    za = jnp.zeros((a.shape[0], b.shape[1]), a.dtype)
    zb = jnp.zeros((b.shape[0], a.shape[1]), b.dtype)
    return jnp.concatenate(
        [jnp.concatenate([a, za], axis=1),
         jnp.concatenate([zb, b], axis=1)], axis=0)


def pack_twin_params(params1, params2, *, weight_dtype=jnp.float32):
    """Pack 2 x 14 per-head params into 8 lane-fused arrays for the kernel."""
    (w1a, b1a, g1a, e1a, w2a, b2a, g2a, e2a,
     w3a, b3a, g3a, e3a, w4a, b4a) = params1
    (w1b, b1b, g1b, e1b, w2b, b2b, g2b, e2b,
     w3b, b3b, g3b, e3b, w4b, b4b) = params2

    def vec_slab(ba, bb, ga, gb, ea, eb):
        return jnp.concatenate(
            [jnp.concatenate([ba, bb], axis=1),
             jnp.concatenate([ga, gb], axis=1),
             jnp.concatenate([ea, eb], axis=1)], axis=0).astype(jnp.float32)

    w1c = jnp.concatenate([w1a, w1b], axis=1).astype(weight_dtype)   # (Din, 2H1)
    w2c = _block_diag(w2a, w2b).astype(weight_dtype)                 # (2H1, 2H2)
    w3c = _block_diag(w3a, w3b).astype(weight_dtype)                 # (2H2, 2H3)
    w4c = _block_diag(w4a, w4b).astype(weight_dtype)                 # (2H3, 2)
    v1 = vec_slab(b1a, b1b, g1a, g1b, e1a, e1b)                      # (3, 2H1)
    v2 = vec_slab(b2a, b2b, g2a, g2b, e2a, e2b)                      # (3, 2H2)
    v3 = vec_slab(b3a, b3b, g3a, g3b, e3a, e3b)                      # (3, 2H3)
    b4c = jnp.concatenate([b4a, b4b], axis=1).astype(jnp.float32)    # (1, 2)
    return (w1c, v1, w2c, v2, w3c, v3, w4c, b4c)


# --------------------------------- wrapper ------------------------------------

def _pick_tile(batch):
    # Largest multiple-of-8 divisor of the batch, capped at 512, while keeping
    # >= 2 grid steps when possible so v7x's two TensorCores both get work.
    cands = [t for t in range(8, min(batch, 512) + 1, 8) if batch % t == 0]
    if not cands:
        # TODO(synk): pad ragged batches to a multiple of 8 instead of failing.
        raise ValueError("batch must be a multiple of 8")
    two_step = [t for t in cands if batch // t >= 2]
    return max(two_step) if two_step else max(cands)


def twin_q_forward(obs, act, params1, params2, *, tile_b=None,
                   use_bf16_matmul=False):
    """Pallas forward for TwinQMLPBase: returns (q1, q2), each (B, 1) f32."""
    x = jnp.concatenate([obs, act], axis=-1).astype(jnp.float32)  # glue in JAX
    B, Din = x.shape
    if tile_b is None:
        tile_b = _pick_tile(B)
    assert B % tile_b == 0, "batch must be a multiple of the batch tile"

    h1 = params1[0].shape[1]
    h2 = params1[4].shape[1]
    h3 = params1[8].shape[1]
    mm_dtype = jnp.bfloat16 if use_bf16_matmul else jnp.float32
    packed = pack_twin_params(params1, params2, weight_dtype=mm_dtype)

    x_spec = pl.BlockSpec((tile_b, Din), lambda i: (i, 0))
    param_specs = [pl.BlockSpec(p.shape, lambda i: (0, 0)) for p in packed]
    out_spec = pl.BlockSpec((tile_b, 2), lambda i: (i, 0))

    kernel = functools.partial(_twin_q_kernel, h1=h1, h2=h2, h3=h3,
                               mm_dtype=mm_dtype)
    q12 = pl.pallas_call(
        kernel,
        out_shape=jax.ShapeDtypeStruct((B, 2), jnp.float32),
        grid_spec=pltpu.PrefetchScalarGridSpec(
            num_scalar_prefetch=0,
            grid=(B // tile_b,),
            in_specs=[x_spec] + param_specs,
            out_specs=out_spec,
        ),
        compiler_params=pltpu.CompilerParams(
            dimension_semantics=("parallel",)),
    )(x, *packed)
    return q12[:, 0:1], q12[:, 1:2]


# ---------------------- deterministic parameter init -------------------------

def _init_head(key, d_in, h1, h2, h3):
    """One Q head: 4 Linear layers (+bias) and 3 LayerNorms (gamma, beta)."""
    ks = jax.random.split(key, 11)

    def lin(kw, kb, fan_in, fan_out):
        bound = (6.0 / (fan_in + fan_out)) ** 0.5
        w = jax.random.uniform(kw, (fan_in, fan_out), jnp.float32, -bound, bound)
        b = 0.05 * jax.random.normal(kb, (1, fan_out), jnp.float32)
        return w, b

    w1, b1 = lin(ks[0], ks[1], d_in, h1)
    w2, b2 = lin(ks[2], ks[3], h1, h2)
    w3, b3 = lin(ks[4], ks[5], h2, h3)
    w4, b4 = lin(ks[6], ks[7], h3, 1)
    # Non-trivial gamma/beta so the packed LayerNorm path is fully exercised.
    g1 = 1.0 + 0.05 * jax.random.normal(ks[8], (1, h1), jnp.float32)
    g2 = 1.0 + 0.05 * jax.random.normal(ks[9], (1, h2), jnp.float32)
    g3 = 1.0 + 0.05 * jax.random.normal(ks[10], (1, h3), jnp.float32)
    e1 = jnp.full((1, h1), 0.01, jnp.float32)
    e2 = jnp.full((1, h2), -0.01, jnp.float32)
    e3 = jnp.full((1, h3), 0.02, jnp.float32)
    return (w1, b1, g1, e1, w2, b2, g2, e2, w3, b3, g3, e3, w4, b4)


# --------------------------- pure-JAX reference -------------------------------

def _ref_head(x, p):
    (w1, b1, g1, e1, w2, b2, g2, e2, w3, b3, g3, e3, w4, b4) = p

    def ln(h, g, b):
        m = jnp.mean(h, axis=-1, keepdims=True)
        v = jnp.mean((h - m) ** 2, axis=-1, keepdims=True)
        return (h - m) / jnp.sqrt(v + _LN_EPS) * g + b

    h = _gelu_exact(ln(x @ w1 + b1, g1, e1))
    h = _gelu_exact(ln(h @ w2 + b2, g2, e2))
    h = _gelu_exact(ln(h @ w3 + b3, g3, e3))
    return h @ w4 + b4


def _ref_forward(obs, act, p1, p2):
    x = jnp.concatenate([obs, act], axis=-1)
    return _ref_head(x, p1), _ref_head(x, p2)


# ---------------------------------- main --------------------------------------

if __name__ == "__main__":
    NUM_INPUTS = 24     # obs dim
    NUM_OUTPUTS = 8     # act dim
    H1 = H2 = H3 = 32   # params.HIDDEN_{1,2,3}_SIZE
    B = 16

    key = jax.random.PRNGKey(0)
    k_obs, k_act, k_p1, k_p2 = jax.random.split(key, 4)

    obs = jax.random.normal(k_obs, (B, NUM_INPUTS), jnp.float32)
    act = jax.random.normal(k_act, (B, NUM_OUTPUTS), jnp.float32)

    d_in = NUM_INPUTS + NUM_OUTPUTS
    params1 = _init_head(k_p1, d_in, H1, H2, H3)
    params2 = _init_head(k_p2, d_in, H1, H2, H3)

    r1, r2 = _ref_forward(obs, act, params1, params2)

    # f32-matmul path: exact semantics of the PyTorch module.
    fwd_f32 = jax.jit(functools.partial(twin_q_forward, use_bf16_matmul=False))
    q1, q2 = fwd_f32(obs, act, params1, params2)
    jax.block_until_ready((q1, q2))
    assert q1.shape == (B, 1) and q2.shape == (B, 1)
    assert jnp.allclose(q1, r1, atol=1e-4, rtol=1e-4)
    assert jnp.allclose(q2, r2, atol=1e-4, rtol=1e-4)

    # bf16-operand matmul path (v6e/v7x MXU-native), f32 accumulation + LN/GELU.
    fwd_bf16 = jax.jit(functools.partial(twin_q_forward, use_bf16_matmul=True))
    q1b, q2b = fwd_bf16(obs, act, params1, params2)
    jax.block_until_ready((q1b, q2b))
    assert jnp.allclose(q1b, r1, atol=5e-2, rtol=5e-2)
    assert jnp.allclose(q2b, r2, atol=5e-2, rtol=5e-2)

    print("KERNEL_OK")
</pallas_src>

<mosaic_0001>
module attributes {stable_mosaic.version = 11 : i64} {
  func.func @_twin_q_kernel(%arg0: i32, %arg1: memref<8x32xf32, #tpu.memory_space<vmem>>, %arg2: memref<32x64xf32, #tpu.memory_space<vmem>>, %arg3: memref<3x64xf32, #tpu.memory_space<vmem>>, %arg4: memref<64x64xf32, #tpu.memory_space<vmem>>, %arg5: memref<3x64xf32, #tpu.memory_space<vmem>>, %arg6: memref<64x64xf32, #tpu.memory_space<vmem>>, %arg7: memref<3x64xf32, #tpu.memory_space<vmem>>, %arg8: memref<64x2xf32, #tpu.memory_space<vmem>>, %arg9: memref<1x2xf32, #tpu.memory_space<vmem>>, %arg10: memref<8x2xf32, #tpu.memory_space<vmem>>) attributes {dimension_semantics = [#tpu.dimension_semantics<parallel>], iteration_bounds = array<i64: 2>, scalar_prefetch = 0 : i64, scratch_operands = 0 : i64, tpu.core_type = #tpu.core_type<tc>, window_params = [{transform_indices = @transform_0, window_bounds = array<i64: 8, 32>}, {pipeline_mode = #tpu.pipeline_mode<synchronous>, transform_indices = @transform_1, window_bounds = array<i64: 32, 64>}, {pipeline_mode = #tpu.pipeline_mode<synchronous>, transform_indices = @transform_2, window_bounds = array<i64: 3, 64>}, {pipeline_mode = #tpu.pipeline_mode<synchronous>, transform_indices = @transform_3, window_bounds = array<i64: 64, 64>}, {pipeline_mode = #tpu.pipeline_mode<synchronous>, transform_indices = @transform_4, window_bounds = array<i64: 3, 64>}, {pipeline_mode = #tpu.pipeline_mode<synchronous>, transform_indices = @transform_5, window_bounds = array<i64: 64, 64>}, {pipeline_mode = #tpu.pipeline_mode<synchronous>, transform_indices = @transform_6, window_bounds = array<i64: 3, 64>}, {pipeline_mode = #tpu.pipeline_mode<synchronous>, transform_indices = @transform_7, window_bounds = array<i64: 64, 2>}, {pipeline_mode = #tpu.pipeline_mode<synchronous>, transform_indices = @transform_8, window_bounds = array<i64: 1, 2>}, {transform_indices = @transform_9, window_bounds = array<i64: 8, 2>}]} {
    %c0 = arith.constant 0 : index
    %c0_0 = arith.constant 0 : index
    %0 = vector.load %arg1[%c0, %c0_0] : memref<8x32xf32, #tpu.memory_space<vmem>>, vector<8x32xf32>
    %c0_1 = arith.constant 0 : index
    %c0_2 = arith.constant 0 : index
    %1 = vector.load %arg2[%c0_1, %c0_2] : memref<32x64xf32, #tpu.memory_space<vmem>>, vector<32x64xf32>
    %cst = arith.constant dense<0.000000e+00> : vector<8x64xf32>
    %2 = tpu.matmul %0, %1, %cst {dimension_numbers = #tpu.dot_dimension_numbers<[1], [0], [0], [1], [0, 0, 1, 1], [], []>} : vector<8x32xf32>, vector<32x64xf32>, vector<8x64xf32> -> vector<8x64xf32>
    %c0_3 = arith.constant 0 : index
    %c0_4 = arith.constant 0 : index
    %3 = vector.load %arg3[%c0_3, %c0_4] : memref<3x64xf32, #tpu.memory_space<vmem>>, vector<3x64xf32>
    %4 = vector.extract_strided_slice %3 {offsets = [0, 0], sizes = [1, 64], strides = [1, 1]} : vector<3x64xf32> to vector<1x64xf32>
    %5 = vector.extract_strided_slice %3 {offsets = [1, 0], sizes = [1, 64], strides = [1, 1]} : vector<3x64xf32> to vector<1x64xf32>
    %6 = vector.extract_strided_slice %3 {offsets = [2, 0], sizes = [1, 64], strides = [1, 1]} : vector<3x64xf32> to vector<1x64xf32>
    %7 = vector.broadcast %4 : vector<1x64xf32> to vector<8x64xf32>
    %8 = arith.addf %2, %7 : vector<8x64xf32>
    %9 = tpu.iota {dimensions = array<i32: 1>} : vector<8x64xi32>
    %c32_i32 = arith.constant 32 : i32
    %10 = vector.broadcast %c32_i32 : i32 to vector<8x64xi32>
    %11 = arith.cmpi slt, %9, %10 : vector<8x64xi32>
    %cst_5 = arith.constant dense<0.000000e+00> : vector<8xf32>
    %12 = vector.multi_reduction <add>, %8, %cst_5 [1] : vector<8x64xf32> to vector<8xf32>
    %13 = vector.shape_cast %12 : vector<8xf32> to vector<8x1xf32>
    %cst_6 = arith.constant 0.000000e+00 : f32
    %14 = vector.broadcast %cst_6 : f32 to vector<8x64xf32>
    %15 = arith.select %11, %8, %14 : vector<8x64xi1>, vector<8x64xf32>
    %cst_7 = arith.constant dense<0.000000e+00> : vector<8xf32>
    %16 = vector.multi_reduction <add>, %15, %cst_7 [1] : vector<8x64xf32> to vector<8xf32>
    %17 = vector.shape_cast %16 : vector<8xf32> to vector<8x1xf32>
    %18 = arith.subf %13, %17 : vector<8x1xf32>
    %19 = vector.shape_cast %17 : vector<8x1xf32> to vector<8x1xf32>
    %20 = vector.broadcast %19 : vector<8x1xf32> to vector<8x64xf32>
    %21 = vector.shape_cast %18 : vector<8x1xf32> to vector<8x1xf32>
    %22 = vector.broadcast %21 : vector<8x1xf32> to vector<8x64xf32>
    %23 = arith.select %11, %20, %22 : vector<8x64xi1>, vector<8x64xf32>
    %cst_8 = arith.constant 3.125000e-02 : f32
    %24 = vector.broadcast %cst_8 : f32 to vector<8x64xf32>
    %25 = arith.mulf %23, %24 : vector<8x64xf32>
    %26 = arith.subf %8, %25 : vector<8x64xf32>
    %27 = arith.mulf %26, %26 : vector<8x64xf32>
    %cst_9 = arith.constant dense<0.000000e+00> : vector<8xf32>
    %28 = vector.multi_reduction <add>, %27, %cst_9 [1] : vector<8x64xf32> to vector<8xf32>
    %29 = vector.shape_cast %28 : vector<8xf32> to vector<8x1xf32>
    %cst_10 = arith.constant 0.000000e+00 : f32
    %30 = vector.broadcast %cst_10 : f32 to vector<8x64xf32>
    %31 = arith.select %11, %27, %30 : vector<8x64xi1>, vector<8x64xf32>
    %cst_11 = arith.constant dense<0.000000e+00> : vector<8xf32>
    %32 = vector.multi_reduction <add>, %31, %cst_11 [1] : vector<8x64xf32> to vector<8xf32>
    %33 = vector.shape_cast %32 : vector<8xf32> to vector<8x1xf32>
    %34 = arith.subf %29, %33 : vector<8x1xf32>
    %35 = vector.shape_cast %33 : vector<8x1xf32> to vector<8x1xf32>
    %36 = vector.broadcast %35 : vector<8x1xf32> to vector<8x64xf32>
    %37 = vector.shape_cast %34 : vector<8x1xf32> to vector<8x1xf32>
    %38 = vector.broadcast %37 : vector<8x1xf32> to vector<8x64xf32>
    %39 = arith.select %11, %36, %38 : vector<8x64xi1>, vector<8x64xf32>
    %cst_12 = arith.constant 3.125000e-02 : f32
    %40 = vector.broadcast %cst_12 : f32 to vector<8x64xf32>
    %41 = arith.mulf %39, %40 : vector<8x64xf32>
    %cst_13 = arith.constant 9.99999974E-6 : f32
    %42 = vector.broadcast %cst_13 : f32 to vector<8x64xf32>
    %43 = arith.addf %41, %42 : vector<8x64xf32>
    %44 = math.rsqrt %43 : vector<8x64xf32>
    %45 = arith.mulf %26, %44 : vector<8x64xf32>
    %46 = vector.broadcast %5 : vector<1x64xf32> to vector<8x64xf32>
    %47 = arith.mulf %45, %46 : vector<8x64xf32>
    %48 = vector.broadcast %6 : vector<1x64xf32> to vector<8x64xf32>
    %49 = arith.addf %47, %48 : vector<8x64xf32>
    %cst_14 = arith.constant 5.000000e-01 : f32
    %50 = vector.broadcast %cst_14 : f32 to vector<8x64xf32>
    %51 = arith.mulf %50, %49 : vector<8x64xf32>
    %cst_15 = arith.constant 0.707106769 : f32
    %52 = vector.broadcast %cst_15 : f32 to vector<8x64xf32>
    %53 = arith.mulf %49, %52 : vector<8x64xf32>
    %54 = math.erf %53 : vector<8x64xf32>
    %cst_16 = arith.constant 1.000000e+00 : f32
    %55 = vector.broadcast %cst_16 : f32 to vector<8x64xf32>
    %56 = arith.addf %55, %54 : vector<8x64xf32>
    %57 = arith.mulf %51, %56 : vector<8x64xf32>
    %c0_17 = arith.constant 0 : index
    %c0_18 = arith.constant 0 : index
    %58 = vector.load %arg4[%c0_17, %c0_18] : memref<64x64xf32, #tpu.memory_space<vmem>>, vector<64x64xf32>
    %cst_19 = arith.constant dense<0.000000e+00> : vector<8x64xf32>
    %59 = tpu.matmul %57, %58, %cst_19 {dimension_numbers = #tpu.dot_dimension_numbers<[1], [0], [0], [1], [0, 0, 1, 1], [], []>} : vector<8x64xf32>, vector<64x64xf32>, vector<8x64xf32> -> vector<8x64xf32>
    %c0_20 = arith.constant 0 : index
    %c0_21 = arith.constant 0 : index
    %60 = vector.load %arg5[%c0_20, %c0_21] : memref<3x64xf32, #tpu.memory_space<vmem>>, vector<3x64xf32>
    %61 = vector.extract_strided_slice %60 {offsets = [0, 0], sizes = [1, 64], strides = [1, 1]} : vector<3x64xf32> to vector<1x64xf32>
    %62 = vector.extract_strided_slice %60 {offsets = [1, 0], sizes = [1, 64], strides = [1, 1]} : vector<3x64xf32> to vector<1x64xf32>
    %63 = vector.extract_strided_slice %60 {offsets = [2, 0], sizes = [1, 64], strides = [1, 1]} : vector<3x64xf32> to vector<1x64xf32>
    %64 = vector.broadcast %61 : vector<1x64xf32> to vector<8x64xf32>
    %65 = arith.addf %59, %64 : vector<8x64xf32>
    %66 = tpu.iota {dimensions = array<i32: 1>} : vector<8x64xi32>
    %c32_i32_22 = arith.constant 32 : i32
    %67 = vector.broadcast %c32_i32_22 : i32 to vector<8x64xi32>
    %68 = arith.cmpi slt, %66, %67 : vector<8x64xi32>
    %cst_23 = arith.constant dense<0.000000e+00> : vector<8xf32>
    %69 = vector.multi_reduction <add>, %65, %cst_23 [1] : vector<8x64xf32> to vector<8xf32>
    %70 = vector.shape_cast %69 : vector<8xf32> to vector<8x1xf32>
    %cst_24 = arith.constant 0.000000e+00 : f32
    %71 = vector.broadcast %cst_24 : f32 to vector<8x64xf32>
    %72 = arith.select %68, %65, %71 : vector<8x64xi1>, vector<8x64xf32>
    %cst_25 = arith.constant dense<0.000000e+00> : vector<8xf32>
    %73 = vector.multi_reduction <add>, %72, %cst_25 [1] : vector<8x64xf32> to vector<8xf32>
    %74 = vector.shape_cast %73 : vector<8xf32> to vector<8x1xf32>
    %75 = arith.subf %70, %74 : vector<8x1xf32>
    %76 = vector.shape_cast %74 : vector<8x1xf32> to vector<8x1xf32>
    %77 = vector.broadcast %76 : vector<8x1xf32> to vector<8x64xf32>
    %78 = vector.shape_cast %75 : vector<8x1xf32> to vector<8x1xf32>
    %79 = vector.broadcast %78 : vector<8x1xf32> to vector<8x64xf32>
    %80 = arith.select %68, %77, %79 : vector<8x64xi1>, vector<8x64xf32>
    %cst_26 = arith.constant 3.125000e-02 : f32
    %81 = vector.broadcast %cst_26 : f32 to vector<8x64xf32>
    %82 = arith.mulf %80, %81 : vector<8x64xf32>
    %83 = arith.subf %65, %82 : vector<8x64xf32>
    %84 = arith.mulf %83, %83 : vector<8x64xf32>
    %cst_27 = arith.constant dense<0.000000e+00> : vector<8xf32>
    %85 = vector.multi_reduction <add>, %84, %cst_27 [1] : vector<8x64xf32> to vector<8xf32>
    %86 = vector.shape_cast %85 : vector<8xf32> to vector<8x1xf32>
    %cst_28 = arith.constant 0.000000e+00 : f32
    %87 = vector.broadcast %cst_28 : f32 to vector<8x64xf32>
    %88 = arith.select %68, %84, %87 : vector<8x64xi1>, vector<8x64xf32>
    %cst_29 = arith.constant dense<0.000000e+00> : vector<8xf32>
    %89 = vector.multi_reduction <add>, %88, %cst_29 [1] : vector<8x64xf32> to vector<8xf32>
    %90 = vector.shape_cast %89 : vector<8xf32> to vector<8x1xf32>
    %91 = arith.subf %86, %90 : vector<8x1xf32>
    %92 = vector.shape_cast %90 : vector<8x1xf32> to vector<8x1xf32>
    %93 = vector.broadcast %92 : vector<8x1xf32> to vector<8x64xf32>
    %94 = vector.shape_cast %91 : vector<8x1xf32> to vector<8x1xf32>
    %95 = vector.broadcast %94 : vector<8x1xf32> to vector<8x64xf32>
    %96 = arith.select %68, %93, %95 : vector<8x64xi1>, vector<8x64xf32>
    %cst_30 = arith.constant 3.125000e-02 : f32
    %97 = vector.broadcast %cst_30 : f32 to vector<8x64xf32>
    %98 = arith.mulf %96, %97 : vector<8x64xf32>
    %cst_31 = arith.constant 9.99999974E-6 : f32
    %99 = vector.broadcast %cst_31 : f32 to vector<8x64xf32>
    %100 = arith.addf %98, %99 : vector<8x64xf32>
    %101 = math.rsqrt %100 : vector<8x64xf32>
    %102 = arith.mulf %83, %101 : vector<8x64xf32>
    %103 = vector.broadcast %62 : vector<1x64xf32> to vector<8x64xf32>
    %104 = arith.mulf %102, %103 : vector<8x64xf32>
    %105 = vector.broadcast %63 : vector<1x64xf32> to vector<8x64xf32>
    %106 = arith.addf %104, %105 : vector<8x64xf32>
    %cst_32 = arith.constant 5.000000e-01 : f32
    %107 = vector.broadcast %cst_32 : f32 to vector<8x64xf32>
    %108 = arith.mulf %107, %106 : vector<8x64xf32>
    %cst_33 = arith.constant 0.707106769 : f32
    %109 = vector.broadcast %cst_33 : f32 to vector<8x64xf32>
    %110 = arith.mulf %106, %109 : vector<8x64xf32>
    %111 = math.erf %110 : vector<8x64xf32>
    %cst_34 = arith.constant 1.000000e+00 : f32
    %112 = vector.broadcast %cst_34 : f32 to vector<8x64xf32>
    %113 = arith.addf %112, %111 : vector<8x64xf32>
    %114 = arith.mulf %108, %113 : vector<8x64xf32>
    %c0_35 = arith.constant 0 : index
    %c0_36 = arith.constant 0 : index
    %115 = vector.load %arg6[%c0_35, %c0_36] : memref<64x64xf32, #tpu.memory_space<vmem>>, vector<64x64xf32>
    %cst_37 = arith.constant dense<0.000000e+00> : vector<8x64xf32>
    %116 = tpu.matmul %114, %115, %cst_37 {dimension_numbers = #tpu.dot_dimension_numbers<[1], [0], [0], [1], [0, 0, 1, 1], [], []>} : vector<8x64xf32>, vector<64x64xf32>, vector<8x64xf32> -> vector<8x64xf32>
    %c0_38 = arith.constant 0 : index
    %c0_39 = arith.constant 0 : index
    %117 = vector.load %arg7[%c0_38, %c0_39] : memref<3x64xf32, #tpu.memory_space<vmem>>, vector<3x64xf32>
    %118 = vector.extract_strided_slice %117 {offsets = [0, 0], sizes = [1, 64], strides = [1, 1]} : vector<3x64xf32> to vector<1x64xf32>
    %119 = vector.extract_strided_slice %117 {offsets = [1, 0], sizes = [1, 64], strides = [1, 1]} : vector<3x64xf32> to vector<1x64xf32>
    %120 = vector.extract_strided_slice %117 {offsets = [2, 0], sizes = [1, 64], strides = [1, 1]} : vector<3x64xf32> to vector<1x64xf32>
    %121 = vector.broadcast %118 : vector<1x64xf32> to vector<8x64xf32>
    %122 = arith.addf %116, %121 : vector<8x64xf32>
    %123 = tpu.iota {dimensions = array<i32: 1>} : vector<8x64xi32>
    %c32_i32_40 = arith.constant 32 : i32
    %124 = vector.broadcast %c32_i32_40 : i32 to vector<8x64xi32>
    %125 = arith.cmpi slt, %123, %124 : vector<8x64xi32>
    %cst_41 = arith.constant dense<0.000000e+00> : vector<8xf32>
    %126 = vector.multi_reduction <add>, %122, %cst_41 [1] : vector<8x64xf32> to vector<8xf32>
    %127 = vector.shape_cast %126 : vector<8xf32> to vector<8x1xf32>
    %cst_42 = arith.constant 0.000000e+00 : f32
    %128 = vector.broadcast %cst_42 : f32 to vector<8x64xf32>
    %129 = arith.select %125, %122, %128 : vector<8x64xi1>, vector<8x64xf32>
    %cst_43 = arith.constant dense<0.000000e+00> : vector<8xf32>
    %130 = vector.multi_reduction <add>, %129, %cst_43 [1] : vector<8x64xf32> to vector<8xf32>
    %131 = vector.shape_cast %130 : vector<8xf32> to vector<8x1xf32>
    %132 = arith.subf %127, %131 : vector<8x1xf32>
    %133 = vector.shape_cast %131 : vector<8x1xf32> to vector<8x1xf32>
    %134 = vector.broadcast %133 : vector<8x1xf32> to vector<8x64xf32>
    %135 = vector.shape_cast %132 : vector<8x1xf32> to vector<8x1xf32>
    %136 = vector.broadcast %135 : vector<8x1xf32> to vector<8x64xf32>
    %137 = arith.select %125, %134, %136 : vector<8x64xi1>, vector<8x64xf32>
    %cst_44 = arith.constant 3.125000e-02 : f32
    %138 = vector.broadcast %cst_44 : f32 to vector<8x64xf32>
    %139 = arith.mulf %137, %138 : vector<8x64xf32>
    %140 = arith.subf %122, %139 : vector<8x64xf32>
    %141 = arith.mulf %140, %140 : vector<8x64xf32>
    %cst_45 = arith.constant dense<0.000000e+00> : vector<8xf32>
    %142 = vector.multi_reduction <add>, %141, %cst_45 [1] : vector<8x64xf32> to vector<8xf32>
    %143 = vector.shape_cast %142 : vector<8xf32> to vector<8x1xf32>
    %cst_46 = arith.constant 0.000000e+00 : f32
    %144 = vector.broadcast %cst_46 : f32 to vector<8x64xf32>
    %145 = arith.select %125, %141, %144 : vector<8x64xi1>, vector<8x64xf32>
    %cst_47 = arith.constant dense<0.000000e+00> : vector<8xf32>
    %146 = vector.multi_reduction <add>, %145, %cst_47 [1] : vector<8x64xf32> to vector<8xf32>
    %147 = vector.shape_cast %146 : vector<8xf32> to vector<8x1xf32>
    %148 = arith.subf %143, %147 : vector<8x1xf32>
    %149 = vector.shape_cast %147 : vector<8x1xf32> to vector<8x1xf32>
    %150 = vector.broadcast %149 : vector<8x1xf32> to vector<8x64xf32>
    %151 = vector.shape_cast %148 : vector<8x1xf32> to vector<8x1xf32>
    %152 = vector.broadcast %151 : vector<8x1xf32> to vector<8x64xf32>
    %153 = arith.select %125, %150, %152 : vector<8x64xi1>, vector<8x64xf32>
    %cst_48 = arith.constant 3.125000e-02 : f32
    %154 = vector.broadcast %cst_48 : f32 to vector<8x64xf32>
    %155 = arith.mulf %153, %154 : vector<8x64xf32>
    %cst_49 = arith.constant 9.99999974E-6 : f32
    %156 = vector.broadcast %cst_49 : f32 to vector<8x64xf32>
    %157 = arith.addf %155, %156 : vector<8x64xf32>
    %158 = math.rsqrt %157 : vector<8x64xf32>
    %159 = arith.mulf %140, %158 : vector<8x64xf32>
    %160 = vector.broadcast %119 : vector<1x64xf32> to vector<8x64xf32>
    %161 = arith.mulf %159, %160 : vector<8x64xf32>
    %162 = vector.broadcast %120 : vector<1x64xf32> to vector<8x64xf32>
    %163 = arith.addf %161, %162 : vector<8x64xf32>
    %cst_50 = arith.constant 5.000000e-01 : f32
    %164 = vector.broadcast %cst_50 : f32 to vector<8x64xf32>
    %165 = arith.mulf %164, %163 : vector<8x64xf32>
    %cst_51 = arith.constant 0.707106769 : f32
    %166 = vector.broadcast %cst_51 : f32 to vector<8x64xf32>
    %167 = arith.mulf %163, %166 : vector<8x64xf32>
    %168 = math.erf %167 : vector<8x64xf32>
    %cst_52 = arith.constant 1.000000e+00 : f32
    %169 = vector.broadcast %cst_52 : f32 to vector<8x64xf32>
    %170 = arith.addf %169, %168 : vector<8x64xf32>
    %171 = arith.mulf %165, %170 : vector<8x64xf32>
    %c0_53 = arith.constant 0 : index
    %c0_54 = arith.constant 0 : index
    %172 = vector.load %arg8[%c0_53, %c0_54] : memref<64x2xf32, #tpu.memory_space<vmem>>, vector<64x2xf32>
    %cst_55 = arith.constant dense<0.000000e+00> : vector<8x2xf32>
    %173 = tpu.matmul %171, %172, %cst_55 {dimension_numbers = #tpu.dot_dimension_numbers<[1], [0], [0], [1], [0, 0, 1, 1], [], []>} : vector<8x64xf32>, vector<64x2xf32>, vector<8x2xf32> -> vector<8x2xf32>
    %c0_56 = arith.constant 0 : index
    %c0_57 = arith.constant 0 : index
    %174 = vector.load %arg9[%c0_56, %c0_57] : memref<1x2xf32, #tpu.memory_space<vmem>>, vector<1x2xf32>
    %175 = vector.broadcast %174 : vector<1x2xf32> to vector<8x2xf32>
    %176 = arith.addf %173, %175 : vector<8x2xf32>
    %c0_58 = arith.constant 0 : index
    %c0_59 = arith.constant 0 : index
    %177 = vector.load %arg10[%c0_58, %c0_59] : memref<8x2xf32, #tpu.memory_space<vmem>>, vector<8x2xf32>
    tpu.vector_store %arg10[%c0_58, %c0_59], %176 {strides = array<i32>} : memref<8x2xf32, #tpu.memory_space<vmem>>, vector<8x2xf32>,
    return
  }
  func.func @transform_0(%arg0: i32) -> (i32, i32) {
    %c0_i32 = arith.constant 0 : i32
    %c0_i32_0 = arith.constant 0 : i32
    return %arg0, %c0_i32 : i32, i32
  }
  func.func @transform_1(%arg0: i32) -> (i32, i32) {
    %c0_i32 = arith.constant 0 : i32
    %c0_i32_0 = arith.constant 0 : i32
    %c0_i32_1 = arith.constant 0 : i32
    return %c0_i32, %c0_i32_0 : i32, i32
  }
  func.func @transform_2(%arg0: i32) -> (i32, i32) {
    %c0_i32 = arith.constant 0 : i32
    %c0_i32_0 = arith.constant 0 : i32
    %c0_i32_1 = arith.constant 0 : i32
    return %c0_i32, %c0_i32_0 : i32, i32
  }
  func.func @transform_3(%arg0: i32) -> (i32, i32) {
    %c0_i32 = arith.constant 0 : i32
    %c0_i32_0 = arith.constant 0 : i32
    %c0_i32_1 = arith.constant 0 : i32
    return %c0_i32, %c0_i32_0 : i32, i32
  }
  func.func @transform_4(%arg0: i32) -> (i32, i32) {
    %c0_i32 = arith.constant 0 : i32
    %c0_i32_0 = arith.constant 0 : i32
    %c0_i32_1 = arith.constant 0 : i32
    return %c0_i32, %c0_i32_0 : i32, i32
  }
  func.func @transform_5(%arg0: i32) -> (i32, i32) {
    %c0_i32 = arith.constant 0 : i32
    %c0_i32_0 = arith.constant 0 : i32
    %c0_i32_1 = arith.constant 0 : i32
    return %c0_i32, %c0_i32_0 : i32, i32
  }
  func.func @transform_6(%arg0: i32) -> (i32, i32) {
    %c0_i32 = arith.constant 0 : i32
    %c0_i32_0 = arith.constant 0 : i32
    %c0_i32_1 = arith.constant 0 : i32
    return %c0_i32, %c0_i32_0 : i32, i32
  }
  func.func @transform_7(%arg0: i32) -> (i32, i32) {
    %c0_i32 = arith.constant 0 : i32
    %c0_i32_0 = arith.constant 0 : i32
    %c0_i32_1 = arith.constant 0 : i32
    return %c0_i32, %c0_i32_0 : i32, i32
  }
  func.func @transform_8(%arg0: i32) -> (i32, i32) {
    %c0_i32 = arith.constant 0 : i32
    %c0_i32_0 = arith.constant 0 : i32
    %c0_i32_1 = arith.constant 0 : i32
    return %c0_i32, %c0_i32_0 : i32, i32
  }
  func.func @transform_9(%arg0: i32) -> (i32, i32) {
    %c0_i32 = arith.constant 0 : i32
    %c0_i32_0 = arith.constant 0 : i32
    return %arg0, %c0_i32 : i32, i32
  }
}

</mosaic_0001>

<bundles_post_ra>
// kernel: twin_q_forward.1
= control target key start
LH: loop header
LB: loop body
LE: loop exit
PB: predicated region body
PF: predicated region fallthrough
CT: control target
= control target key end

     0   :  { %s1047_s30 = smov 0   ;;  %s1265_s0 = inlined_call_operand.vmem [shape: f32[16,32], index: 0, kind: input, shape index: {}]   ;;  %s1266_s1 = inlined_call_operand.vmem [shape: f32[32,64], index: 1, kind: input, shape index: {}]   ;;  %s1267_s2 = inlined_call_operand.vmem [shape: f32[3,64], index: 2, kind: input, shape index: {}]   ;;  %s1268_s3 = inlined_call_operand.vmem [shape: f32[64,64], index: 3, kind: input, shape index: {}]   ;;  %s1269_s4 = inlined_call_operand.vmem [shape: f32[3,64], index: 4, kind: input, shape index: {}]   ;;  %s1270_s5 = inlined_call_operand.vmem [shape: f32[64,64], index: 5, kind: input, shape index: {}]   ;;  %s1271_s6 = inlined_call_operand.vmem [shape: f32[3,64], index: 6, kind: input, shape index: {}]   ;;  %s1272_s7 = inlined_call_operand.vmem [shape: f32[64,2], index: 7, kind: input, shape index: {}]   ;;  %s1273_s8 = inlined_call_operand.vmem [shape: f32[1,2], index: 8, kind: input, shape index: {}]   ;;  %s1274_s9 = inlined_call_operand.vmem [shape: f32[16,2], index: 9, kind: output, shape index: {}]  }
   0x1 LB: > { %s851_s10 = sadd.s32 4294967295, %s993_s30   ;;  %p855_p0 = scmp.ge.s32.totalorder %s993_s30, 1  ;;  %s993_s30 = sphi %s1047_s30, %s19_s30  }
   0x2   : > { %p286_p1 = scmp.lt.s32.totalorder %s993_s30, 3 }
   0x4   : > { %p287_p2 = pnand %p855_p0, %p286_p1 }
   0x5   : > { %p320_p3 = scmp.lt.s32.totalorder (!%p287_p2), %s851_s10, 1 }
   0x6   : > { %290 = sbr.rel (%p287_p2) target bundleno = 1815 (0x717), region = 56 }
   0xb   : > { %v332_v0 = vld [vmem:[%s1266_s1 + $0x18] sm:$0xff]  ;;  %v995_v1 = vmov 0.0   ;;  %v331_v2 = vld [vmem:[%s1266_s1 + $0x10] sm:$0xff]  ;;  %vm996_vm0 = vmmov 0   ;;  %s1276_s10 = smov (!%p320_p3, %s851_s10), 1  ;;  %v330_v3 = vld [vmem:[%s1266_s1 + $0x8] sm:$0xff]  ;;  %v334_v6 = vlaneseq }
   0xc   : > { %897 = vmatprep.subr.mxu0 %v995_v1  ;;  %905 = vmatprep.mubr.msk.f32.mxu0 %vm996_vm0, %v995_v1  ;;  %s856_s17 = sshll.u32 %s1276_s10, 3  ;;  %v329_v4 = vld [vmem:[%s1266_s1] sm:$0xff]  ;;  %vm338_vm1 = vcmask 261120   ;;  %vm415_vm2 = vcmask 523264   ;;  %v463_v28 = vld [vmem:[%s1268_s3 + $0x38] sm:$0xff]  ;;  %v462_v29 = vld [vmem:[%s1268_s3 + $0x30] sm:$0xff] }
   0xd   : > { %898 = vmatpush3.msra.mxu0 %v332_v0  ;;  %908 = vmatprep.subr.mxu1 %v995_v1  ;;  %s323_s22 = scalar_lea.vmem %s1265_s0, %s856_s17  ;;  %v335_v7 = vshrl.u32 %v334_v6, 7  ;;  %v1092_v9 = vld [vmem:[%s1267_s2] sm:$0x7]  ;;  %v1096_v11 = vand.u32 127, %v334_v6  ;;  %v461_v30 = vld [vmem:[%s1268_s3 + $0x28] sm:$0xff]  ;;  %v459_v32 = vld [vmem:[%s1268_s3 + $0x18] sm:$0xff]  ;;  %s327_s27 = scalar_lea.vmem %s1274_s9, %s856_s17 }
   0xe   : > { %899 = vmatprep.subr.mxu0 %v995_v1  ;;  %924 = vmatprep.mubr.msk.f32.mxu1 %vm996_vm0, %v995_v1  ;;  %v328_v5 = vld [vmem:[%s323_s22] sm:$0xff]  ;;  %v458_v33 = vld [vmem:[%s1268_s3 + $0x10] sm:$0xff]  ;;  %v457_v34 = vld [vmem:[%s1268_s3 + $0x8] sm:$0xff]  ;;  %vm796_vm4 = vcmask 15360  }
   0xf   : > { %900 = vmatpush3.msra.mxu0 %v331_v2  ;;  %v1087_v8 = vsub.s32 0, %v335_v7  ;;  %vm414_vm3 = vcmp.lt.s32.totalorder %v1096_v11, 32  ;;  %909 = vmatpush3.msra.mxu1 %v463_v28  ;;  %v460_v31 = vld [vmem:[%s1268_s3 + $0x20] sm:$0xff]  ;;  %v1143_v42 = vsub.s32 1, %v335_v7  ;;  %v1145_v43 = vsub.s32 2, %v335_v7 }
  0x10   : > { %901 = vmatprep.subr.mxu0 %v995_v1  ;;  %910 = vmatprep.subr.mxu1 %v995_v1  ;;  %v456_v35 = vld [vmem:[%s1268_s3] sm:$0xff] }
  0x11   : > { %902 = vmatpush3.msra.mxu0 %v330_v3  ;;  %v337_v10 = vrot.slane %v1092_v9, %v1087_v8  ;;  %911 = vmatpush3.msra.mxu1 %v462_v29  ;;  %v444_v44 = vrot.slane %v1092_v9, %v1143_v42  ;;  %v449_v46 = vrot.slane %v1092_v9, %v1145_v43  ;;  %v464_v55 = vld [vmem:[%s1269_s4] sm:$0x7] }
  0x12   : > { %903 = vmatprep.subr.mxu0 %v995_v1  ;;  %912 = vmatprep.subr.mxu1 %v995_v1  ;;  %v468_v56 = vrot.slane %v464_v55, %v1087_v8  ;;  %v575_v28 = vrot.slane %v464_v55, %v1145_v43  ;;  %v861_v11 = vld [vmem:[%s1273_s8] ss:$0 sm:$0xff] }
  0x13   : > { %904 = vmatpush3.msra.mxu0 %v329_v4  ;;  %913 = vmatpush3.msra.mxu1 %v461_v30 }
  0x14   : > { %906 = vmatmul.mubr.msk.f32.vlgmr.msra.gmra.mxu0 %vm338_vm1, %v328_v5  ;;  %927 = vmatprep.subr.mxu0 %v995_v1 }
  0x15   : > { %943 = vmatprep.mubr.msk.f32.mxu0 %vm996_vm0, %v995_v1  ;;  %914 = vmatprep.subr.mxu1 %v995_v1 }
  0x16   : > { %915 = vmatpush3.msra.mxu1 %v460_v31 }
  0x17   : > { %916 = vmatprep.subr.mxu1 %v995_v1 }
  0x18   : > { %917 = vmatpush3.msra.mxu1 %v459_v32 }
  0x19   : > { %918 = vmatprep.subr.mxu1 %v995_v1 }
  0x1a   : > { %919 = vmatpush3.msra.mxu1 %v458_v33 }
  0x1b   : > { %920 = vmatprep.subr.mxu1 %v995_v1 }
  0x1c   : > { %921 = vmatpush3.msra.mxu1 %v457_v34 }
  0x1d   : > { %922 = vmatprep.subr.mxu1 %v995_v1 }
  0x1e   : > { %923 = vmatpush3.msra.mxu1 %v456_v35 }
  0x1f   : > { %946 = vmatprep.subr.mxu1 %v995_v1 }
  0xd4   : > { %v408_v12 = vpop.f32.mrf.mxu0 }
  0xd5   : > { %v409_v13 = vadd.f32 %v408_v12, %v337_v10  ;;  %v589_v12 = vld [vmem:[%s1270_s5 + $0x38] sm:$0xff] }
  0xd6   : > { %v907_v14 = vpop.f32.mrf.mxu0  ;;  %928 = vmatpush3.msra.mxu0 %v589_v12 }
  0xd7   : > { %v416_v15 = vsel %vm415_vm2, %v409_v13, 0.0  ;;  %v419_v16 = vsel %vm414_vm3, %v409_v13, 0.0  ;;  %929 = vmatprep.subr.mxu0 %v995_v1  ;;  %v587_v14 = vld [vmem:[%s1270_s5 + $0x28] sm:$0xff] }
  0xd8   : > { %417 = vadd.xlane.f32.xlu0 %v416_v15  ;;  %v420_v17 = vsel %vm415_vm2, %v419_v16, 0.0  ;;  %v586_v15 = vld [vmem:[%s1270_s5 + $0x20] sm:$0xff]  ;;  %v585_v16 = vld [vmem:[%s1270_s5 + $0x18] sm:$0xff] }
  0xdc   : > { %421 = vadd.xlane.f32.xlu0 %v420_v17  ;;  %v584_v17 = vld [vmem:[%s1270_s5 + $0x10] sm:$0xff] }
 0x161   : > { %v418_v18 = vpop.xlane.xlu0 %417 }
 0x165   : > { %v422_v19 = vpop.xlane.xlu0 %421 }
 0x166   : > { %v423_v20 = vsub.f32 %v418_v18, %v422_v19  ;;  %v583_v18 = vld [vmem:[%s1270_s5 + $0x8] sm:$0xff] }
 0x168   : > { %v424_v21 = vsel %vm414_vm3, %v422_v19, %v423_v20  ;;  %v582_v19 = vld [vmem:[%s1270_s5] sm:$0xff] }
 0x169   : > { %v425_v22 = vmul.f32 0.03125, %v424_v21 }
 0x16b   : > { %v426_v23 = vsub.f32 %v409_v13, %v425_v22  ;;  %v588_v13 = vld [vmem:[%s1270_s5 + $0x30] sm:$0xff] }
 0x16c   : > { %930 = vmatpush3.msra.mxu0 %v588_v13 }
 0x16d   : > { %v427_v24 = vmul.f32 %v426_v23, %v426_v23  ;;  %931 = vmatprep.subr.mxu0 %v995_v1 }
 0x16e   : > { %932 = vmatpush3.msra.mxu0 %v587_v14 }
 0x16f   : > { %v428_v25 = vsel %vm415_vm2, %v427_v24, 0.0  ;;  %v431_v26 = vsel %vm414_vm3, %v427_v24, 0.0  ;;  %933 = vmatprep.subr.mxu0 %v995_v1 }
 0x170   : > { %429 = vadd.xlane.f32.xlu1 %v428_v25  ;;  %v432_v27 = vsel %vm415_vm2, %v431_v26, 0.0  ;;  %934 = vmatpush3.msra.mxu0 %v586_v15  ;;  %v570_v26 = vrot.slane %v464_v55, %v1143_v42 }
 0x171   : > { %935 = vmatprep.subr.mxu0 %v995_v1 }
 0x172   : > { %936 = vmatpush3.msra.mxu0 %v585_v16 }
 0x173   : > { %937 = vmatprep.subr.mxu0 %v995_v1 }
 0x174   : > { %433 = vadd.xlane.f32.xlu1 %v432_v27  ;;  %938 = vmatpush3.msra.mxu0 %v584_v17 }
 0x175   : > { %939 = vmatprep.subr.mxu0 %v995_v1 }
 0x176   : > { %940 = vmatpush3.msra.mxu0 %v583_v18 }
 0x177   : > { %941 = vmatprep.subr.mxu0 %v995_v1 }
 0x178   : > { %942 = vmatpush3.msra.mxu0 %v582_v19 }
 0x1f9   : > { %v430_v36 = vpop.xlane.xlu1 %429 }
 0x1fd   : > { %v434_v37 = vpop.xlane.xlu1 %433 }
 0x1fe   : > { %v435_v38 = vsub.f32 %v430_v36, %v434_v37 }
 0x200   : > { %v436_v39 = vsel %vm414_vm3, %v434_v37, %v435_v38  ;;  %v590_v37 = vld [vmem:[%s1271_s6] sm:$0x7] }
 0x201   : > { %v437_v40 = vmul.f32 0.03125, %v436_v39  ;;  %v594_v38 = vrot.slane %v590_v37, %v1087_v8 }
 0x203   : > { %v438_v41 = vadd.f32 1e-05, %v437_v40 }
 0x205   : > { %975 = vrsqrt.f32 %v438_v41 }
 0x212   : > { %v976_v45 = vpop.eup %975 }
 0x213   : > { %v440_v47 = vmul.f32 %v976_v45, %v426_v23 }
 0x215   : > { %v445_v48 = vmul.f32 %v444_v44, %v440_v47 }
 0x217   : > { %v450_v49 = vadd.f32 %v449_v46, %v445_v48 }
 0x219   : > { %v452_v50 = vmul.f32 0.70710677, %v450_v49  ;;  %v451_v52 = vmul.f32 0.5, %v450_v49 }
 0x21b   : > { %977 = verf.f32 %v452_v50 }
 0x228   : > { %v978_v51 = vpop.eup %977 }
 0x229   : > { %v454_v53 = vadd.f32 1.0, %v978_v51 }
 0x22b   : > { %v455_v54 = vmul.f32 %v454_v53, %v451_v52 }
 0x22d   : > { %925 = vmatmul.mubr.msk.f32.vlgmr.msra.gmra.mxu1 %vm415_vm2, %v455_v54 }
 0x22e   : > { %962 = vmatprep.mubr.msk.f32.mxu1 %vm996_vm0, %v995_v1 }
 0x2ed   : > { %v538_v57 = vpop.f32.mrf.mxu1 }
 0x2ee   : > { %v539_v58 = vadd.f32 %v538_v57, %v468_v56  ;;  %v715_v56 = vld [vmem:[%s1272_s7 + $0x38] sm:$0xff]  ;;  %v714_v57 = vld [vmem:[%s1272_s7 + $0x30] sm:$0xff] }
 0x2ef   : > { %v926_v59 = vpop.f32.mrf.mxu1  ;;  %947 = vmatpush3.msra.mxu1 %v715_v56 }
 0x2f0   : > { %v542_v60 = vsel %vm415_vm2, %v539_v58, 0.0  ;;  %v545_v61 = vsel %vm414_vm3, %v539_v58, 0.0  ;;  %948 = vmatprep.subr.mxu1 %v995_v1  ;;  %v712_v59 = vld [vmem:[%s1272_s7 + $0x20] sm:$0xff] }
 0x2f1   : > { %543 = vadd.xlane.f32.xlu0 %v542_v60  ;;  %v546_v62 = vsel %vm415_vm2, %v545_v61, 0.0  ;;  %949 = vmatpush3.msra.mxu1 %v714_v57  ;;  %v711_v60 = vld [vmem:[%s1272_s7 + $0x18] sm:$0xff]  ;;  %v710_v61 = vld [vmem:[%s1272_s7 + $0x10] sm:$0xff] }
 0x2f2   : > { %547 = vadd.xlane.f32.xlu1 %v546_v62  ;;  %950 = vmatprep.subr.mxu1 %v995_v1  ;;  %v709_v62 = vld [vmem:[%s1272_s7 + $0x8] sm:$0xff] }
 0x37a   : > { %v544_v63 = vpop.xlane.xlu0 %543 }
 0x37b   : > { %v548_v0 = vpop.xlane.xlu1 %547 }
 0x37c   : > { %v549_v2 = vsub.f32 %v544_v63, %v548_v0  ;;  %v708_v63 = vld [vmem:[%s1272_s7] sm:$0xff] }
 0x37e   : > { %v550_v3 = vsel %vm414_vm3, %v548_v0, %v549_v2 }
 0x37f   : > { %v551_v4 = vmul.f32 0.03125, %v550_v3 }
 0x381   : > { %v552_v5 = vsub.f32 %v539_v58, %v551_v4  ;;  %v713_v58 = vld [vmem:[%s1272_s7 + $0x28] sm:$0xff] }
 0x382   : > { %951 = vmatpush3.msra.mxu1 %v713_v58 }
 0x383   : > { %v553_v6 = vmul.f32 %v552_v5, %v552_v5  ;;  %952 = vmatprep.subr.mxu1 %v995_v1 }
 0x384   : > { %953 = vmatpush3.msra.mxu1 %v712_v59 }
 0x385   : > { %v554_v7 = vsel %vm415_vm2, %v553_v6, 0.0  ;;  %v557_v9 = vsel %vm414_vm3, %v553_v6, 0.0  ;;  %954 = vmatprep.subr.mxu1 %v995_v1 }
 0x386   : > { %555 = vadd.xlane.f32.xlu0 %v554_v7  ;;  %v558_v10 = vsel %vm415_vm2, %v557_v9, 0.0  ;;  %955 = vmatpush3.msra.mxu1 %v711_v60  ;;  %v696_v7 = vrot.slane %v590_v37, %v1143_v42 }
 0x387   : > { %559 = vadd.xlane.f32.xlu1 %v558_v10  ;;  %956 = vmatprep.subr.mxu1 %v995_v1  ;;  %v701_v10 = vrot.slane %v590_v37, %v1145_v43 }
 0x388   : > { %957 = vmatpush3.msra.mxu1 %v710_v61 }
 0x389   : > { %958 = vmatprep.subr.mxu1 %v995_v1 }
 0x38a   : > { %959 = vmatpush3.msra.mxu1 %v709_v62 }
 0x38b   : > { %960 = vmatprep.subr.mxu1 %v995_v1 }
 0x38c   : > { %961 = vmatpush3.msra.mxu1 %v708_v63 }
 0x40f   : > { %v556_v20 = vpop.xlane.xlu0 %555 }
 0x410   : > { %v560_v21 = vpop.xlane.xlu1 %559 }
 0x411   : > { %v561_v22 = vsub.f32 %v556_v20, %v560_v21 }
 0x413   : > { %v562_v23 = vsel %vm414_vm3, %v560_v21, %v561_v22 }
 0x414   : > { %v563_v24 = vmul.f32 0.03125, %v562_v23 }
 0x416   : > { %v564_v25 = vadd.f32 1e-05, %v563_v24 }
 0x418   : > { %979 = vrsqrt.f32 %v564_v25 }
 0x425   : > { %v980_v27 = vpop.eup %979 }
 0x426   : > { %v566_v29 = vmul.f32 %v980_v27, %v552_v5 }
 0x428   : > { %v571_v30 = vmul.f32 %v570_v26, %v566_v29 }
 0x42a   : > { %v576_v31 = vadd.f32 %v575_v28, %v571_v30 }
 0x42c   : > { %v578_v32 = vmul.f32 0.70710677, %v576_v31  ;;  %v577_v34 = vmul.f32 0.5, %v576_v31 }
 0x42e   : > { %981 = verf.f32 %v578_v32 }
 0x43b   : > { %v982_v33 = vpop.eup %981 }
 0x43c   : > { %v580_v35 = vadd.f32 1.0, %v982_v33 }
 0x43e   : > { %v581_v36 = vmul.f32 %v580_v35, %v577_v34 }
 0x440   : > { %944 = vmatmul.mubr.msk.f32.vlgmr.msra.gmra.mxu0 %vm415_vm2, %v581_v36 }
 0x500   : > { %v664_v39 = vpop.f32.mrf.mxu0 }
 0x501   : > { %v665_v40 = vadd.f32 %v664_v39, %v594_v38 }
 0x502   : > { %v945_v41 = vpop.f32.mrf.mxu0 }
 0x503   : > { %v668_v44 = vsel %vm415_vm2, %v665_v40, 0.0  ;;  %v671_v45 = vsel %vm414_vm3, %v665_v40, 0.0 }
 0x504   : > { %669 = vadd.xlane.f32.xlu0 %v668_v44  ;;  %v672_v46 = vsel %vm415_vm2, %v671_v45, 0.0 }
 0x505   : > { %673 = vadd.xlane.f32.xlu1 %v672_v46 }
 0x58d   : > { %v670_v47 = vpop.xlane.xlu0 %669 }
 0x58e   : > { %v674_v48 = vpop.xlane.xlu1 %673 }
 0x58f   : > { %v675_v49 = vsub.f32 %v670_v47, %v674_v48 }
 0x591   : > { %v676_v50 = vsel %vm414_vm3, %v674_v48, %v675_v49 }
 0x592   : > { %v677_v51 = vmul.f32 0.03125, %v676_v50 }
 0x594   : > { %v678_v8 = vsub.f32 %v665_v40, %v677_v51 }
 0x596   : > { %v679_v52 = vmul.f32 %v678_v8, %v678_v8 }
 0x598   : > { %v680_v53 = vsel %vm415_vm2, %v679_v52, 0.0  ;;  %v683_v54 = vsel %vm414_vm3, %v679_v52, 0.0 }
 0x599   : > { %681 = vadd.xlane.f32.xlu0 %v680_v53  ;;  %v684_v55 = vsel %vm415_vm2, %v683_v54, 0.0 }
 0x59a   : > { %685 = vadd.xlane.f32.xlu1 %v684_v55 }
 0x622   : > { %v682_v0 = vpop.xlane.xlu0 %681 }
 0x623   : > { %v686_v2 = vpop.xlane.xlu1 %685 }
 0x624   : > { %v687_v3 = vsub.f32 %v682_v0, %v686_v2 }
 0x626   : > { %v688_v4 = vsel %vm414_vm3, %v686_v2, %v687_v3 }
 0x627   : > { %v689_v5 = vmul.f32 0.03125, %v688_v4 }
 0x629   : > { %v690_v6 = vadd.f32 1e-05, %v689_v5 }
 0x62b   : > { %983 = vrsqrt.f32 %v690_v6 }
 0x638   : > { %v984_v9 = vpop.eup %983 }
 0x639   : > { %v692_v12 = vmul.f32 %v984_v9, %v678_v8 }
 0x63b   : > { %v697_v13 = vmul.f32 %v696_v7, %v692_v12 }
 0x63d   : > { %v702_v14 = vadd.f32 %v701_v10, %v697_v13 }
 0x63f   : > { %v704_v1 = vmul.f32 0.70710677, %v702_v14  ;;  %v703_v16 = vmul.f32 0.5, %v702_v14 }
 0x641   : > { %985 = verf.f32 %v704_v1 }
 0x64e   : > { %v986_v15 = vpop.eup %985 }
 0x64f   : > { %v706_v17 = vadd.f32 1.0, %v986_v15 }
 0x651   : > { %v707_v18 = vmul.f32 %v706_v17, %v703_v16 }
 0x653   : > { %963 = vmatmul.mubr.msk.f32.vlgmr.msra.gmra.mxu1 %vm415_vm2, %v707_v18 }
 0x713   : > { %v792_v42 = vpop.f32.mrf.mxu1 }
 0x714   : > { %v793_v43 = vadd.f32 %v861_v11, %v792_v42 }
 0x715   : > { %v964_v19 = vpop.f32.mrf.mxu1 }
 0x716   : > { %797 = vst.msk [vmem:[%s327_s27] sm:$0xff] %vm796_vm4, %v793_v43 }
 0x717 PF: > { %s19_s30 = sadd.s32 1, %s993_s30  }
 0x718   : > { %p16_p4 = scmp.ge.s32.totalorder %s19_s30, 4  }
 0x71a   :  { %18 = sbr.rel (!%p16_p4) target bundleno = 1 (0x1), region = 86 }

</bundles_post_ra>
